<compile_context>
chip_gen: v7x
topology: tpu7x:2x2x1
jax: 0.10.0
libtpu: 0.0.40
codegen_flags: <defaults>
</compile_context>

<pallas_src>
import jax
import jax.numpy as jnp
from jax.experimental import pallas as pl
from jax.experimental.pallas import tpu as pltpu


def _scale_conv1x1_kernel(x_ref, s_ref, w_ref, o_ref):
    # x_ref: (1, C, L)   activation for one batch element, channels-major
    # s_ref: (1, C)      per-channel scale for this batch element
    # w_ref: (O, C)      1x1 conv weight
    # o_ref: (1, O, L)   output for this batch element
    w_scaled = w_ref[...] * s_ref[...]                 # fold scale into small weight (VPU)
    o_ref[0] = jnp.dot(                                 # 1x1 conv == matmul (MXU)
        w_scaled, x_ref[0], preferred_element_type=jnp.float32
    ).astype(o_ref.dtype)


def mul_conv1x1(x_nchw, scale_nc11, weight_oc11):
    """Computes conv2d_1x1(x * scale), matching the PyTorch module's forward."""
    N, C, H, W = x_nchw.shape
    O = weight_oc11.shape[0]
    L = H * W

    # Glue: all reshapes below are free (no data movement) for contiguous NCHW / OIHW.
    x_mat = x_nchw.reshape(N, C, L)        # (N, C, HW)
    s_mat = scale_nc11.reshape(N, C)       # per-sample, per-channel scale
    w_mat = weight_oc11.reshape(O, C)      # (O, C) -- no transpose needed

    out = pl.pallas_call(
        _scale_conv1x1_kernel,
        out_shape=jax.ShapeDtypeStruct((N, O, L), x_nchw.dtype),
        grid=(N,),
        in_specs=[
            pl.BlockSpec((1, C, L), lambda b: (b, 0, 0)),
            pl.BlockSpec((1, C), lambda b: (b, 0)),
            pl.BlockSpec((O, C), lambda b: (0, 0)),
        ],
        out_specs=pl.BlockSpec((1, O, L), lambda b: (b, 0, 0)),
        compiler_params=pltpu.CompilerParams(
            dimension_semantics=("parallel",),
        ),
    )(x_mat, s_mat, w_mat)

    return out.reshape(N, O, H, W)


def _reference(x_nchw, scale_nc11, weight_oc11):
    x85 = x_nchw * scale_nc11
    return jax.lax.conv_general_dilated(
        x85, weight_oc11, window_strides=(1, 1), padding="VALID",
        dimension_numbers=("NCHW", "OIHW", "NCHW"),
    )


if __name__ == "__main__":
    key = jax.random.PRNGKey(0)
    k1, k2, k3, k4, k5 = jax.random.split(key, 5)

    # Shapes implied by the module's forward.
    N, C, H, W, O = 1, 240, 14, 14, 80
    x79 = jax.random.normal(k1, (N, C, H, W), dtype=jnp.float32)
    x84 = jax.random.normal(k2, (N, C, 1, 1), dtype=jnp.float32)
    # Deterministic conv weight (Conv2d(240, 80, 1, 1, bias=False)).
    weight = (jax.random.normal(k3, (O, C, 1, 1), dtype=jnp.float32)
              * (1.0 / jnp.sqrt(C)))

    out = mul_conv1x1(x79, x84, weight)
    out = jax.block_until_ready(out)

    ref = _reference(x79, x84, weight)
    assert out.shape == (N, O, H, W)
    assert jnp.allclose(out, ref, atol=1e-4, rtol=1e-4)

    # Extra check: batch > 1 with per-sample scales (generality of the wrapper).
    N2 = 2
    x79b = jax.random.normal(k4, (N2, C, H, W), dtype=jnp.float32)
    x84b = jax.random.normal(k5, (N2, C, 1, 1), dtype=jnp.float32)
    outb = jax.block_until_ready(mul_conv1x1(x79b, x84b, weight))
    refb = _reference(x79b, x84b, weight)
    assert jnp.allclose(outb, refb, atol=1e-4, rtol=1e-4)

    print("KERNEL_OK")
</pallas_src>

<mosaic_0001>
module attributes {stable_mosaic.version = 11 : i64} {
  func.func @_scale_conv1x1_kernel(%arg0: i32, %arg1: memref<1x240x196xf32, #tpu.memory_space<vmem>>, %arg2: memref<1x240xf32, #tpu.memory_space<vmem>>, %arg3: memref<80x240xf32, #tpu.memory_space<vmem>>, %arg4: memref<1x80x196xf32, #tpu.memory_space<vmem>>) attributes {dimension_semantics = [#tpu.dimension_semantics<parallel>], iteration_bounds = array<i64: 1>, scalar_prefetch = 0 : i64, scratch_operands = 0 : i64, tpu.core_type = #tpu.core_type<tc>, window_params = [{transform_indices = @transform_0, window_bounds = array<i64: 1, 240, 196>}, {transform_indices = @transform_1, window_bounds = array<i64: 1, 240>}, {pipeline_mode = #tpu.pipeline_mode<synchronous>, transform_indices = @transform_2, window_bounds = array<i64: 80, 240>}, {transform_indices = @transform_3, window_bounds = array<i64: 1, 80, 196>}]} {
    %c0 = arith.constant 0 : index
    %c0_0 = arith.constant 0 : index
    %0 = vector.load %arg3[%c0, %c0_0] : memref<80x240xf32, #tpu.memory_space<vmem>>, vector<80x240xf32>
    %c0_1 = arith.constant 0 : index
    %c0_2 = arith.constant 0 : index
    %1 = vector.load %arg2[%c0_1, %c0_2] : memref<1x240xf32, #tpu.memory_space<vmem>>, vector<1x240xf32>
    %2 = vector.broadcast %1 : vector<1x240xf32> to vector<80x240xf32>
    %3 = arith.mulf %0, %2 : vector<80x240xf32>
    %c0_3 = arith.constant 0 : index
    %c0_4 = arith.constant 0 : index
    %c0_5 = arith.constant 0 : index
    %4 = vector.load %arg1[%c0_3, %c0_4, %c0_5] : memref<1x240x196xf32, #tpu.memory_space<vmem>>, vector<1x240x196xf32>
    %5 = vector.shape_cast %4 : vector<1x240x196xf32> to vector<240x196xf32>
    %cst = arith.constant dense<0.000000e+00> : vector<80x196xf32>
    %6 = tpu.matmul %3, %5, %cst {dimension_numbers = #tpu.dot_dimension_numbers<[1], [0], [0], [1], [0, 0, 1, 1], [], []>} : vector<80x240xf32>, vector<240x196xf32>, vector<80x196xf32> -> vector<80x196xf32>
    %c0_6 = arith.constant 0 : index
    %c0_7 = arith.constant 0 : index
    %c0_8 = arith.constant 0 : index
    %7 = vector.load %arg4[%c0_6, %c0_7, %c0_8] : memref<1x80x196xf32, #tpu.memory_space<vmem>>, vector<1x80x196xf32>
    %8 = vector.shape_cast %7 : vector<1x80x196xf32> to vector<80x196xf32>
    %9 = vector.shape_cast %6 : vector<80x196xf32> to vector<1x80x196xf32>
    tpu.vector_store %arg4[%c0_6, %c0_7, %c0_8], %9 {strides = array<i32>} : memref<1x80x196xf32, #tpu.memory_space<vmem>>, vector<1x80x196xf32>,
    return
  }
  func.func @transform_0(%arg0: i32) -> (i32, i32, i32) {
    %c0_i32 = arith.constant 0 : i32
    %c0_i32_0 = arith.constant 0 : i32
    %c0_i32_1 = arith.constant 0 : i32
    return %arg0, %c0_i32, %c0_i32_0 : i32, i32, i32
  }
  func.func @transform_1(%arg0: i32) -> (i32, i32) {
    %c0_i32 = arith.constant 0 : i32
    %c0_i32_0 = arith.constant 0 : i32
    return %arg0, %c0_i32 : i32, i32
  }
  func.func @transform_2(%arg0: i32) -> (i32, i32) {
    %c0_i32 = arith.constant 0 : i32
    %c0_i32_0 = arith.constant 0 : i32
    %c0_i32_1 = arith.constant 0 : i32
    return %c0_i32, %c0_i32_0 : i32, i32
  }
  func.func @transform_3(%arg0: i32) -> (i32, i32, i32) {
    %c0_i32 = arith.constant 0 : i32
    %c0_i32_0 = arith.constant 0 : i32
    %c0_i32_1 = arith.constant 0 : i32
    return %arg0, %c0_i32, %c0_i32_0 : i32, i32, i32
  }
}

</mosaic_0001>

<bundles_post_ra>
// kernel: tpu_custom_call.1
= control target key start
LH: loop header
LB: loop body
LE: loop exit
PB: predicated region body
PF: predicated region fallthrough
CT: control target
= control target key end

     0   :  { %v37_v23 = vlaneseq  ;;  %vm127_vm0 = vcmask 916480   ;;  %s765_s0 = inlined_call_operand.vmem [shape: f32[1,240,196], index: 0, kind: input, shape index: {}]   ;;  %s766_s1 = inlined_call_operand.vmem [shape: f32[1,240], index: 1, kind: input, shape index: {}]   ;;  %s767_s2 = inlined_call_operand.vmem [shape: f32[80,240], index: 2, kind: input, shape index: {}]   ;;  %s768_s3 = inlined_call_operand.hbm [shape: f32[1,80,196], index: 3, kind: output, shape index: {}]  }
   0x1   :  { %v68_v0 = vld [vmem:[%s765_s0 + $0x8] sm:$0xff]  ;;  %v70_v1 = vld [vmem:[%s765_s0 + $0x18] sm:$0xff]  ;;  %v67_v2 = vld [vmem:[%s765_s0] sm:$0xff] }
   0x2   :  { %v330_v3 = vpack.c.bf16 %v70_v1, %v68_v0  ;;  %v69_v4 = vld [vmem:[%s765_s0 + $0x10] sm:$0xff]  ;;  %v72_v5 = vld [vmem:[%s765_s0 + $0x28] sm:$0xff]  ;;  %v74_v6 = vld [vmem:[%s765_s0 + $0x38] sm:$0xff]  ;;  %v530_v30 = vshrl.u32 %v37_v23, 7 }
   0x3   :  { %v332_v7 = vpack.c.bf16 %v69_v4, %v67_v2  ;;  %v334_v8 = vpack.c.bf16 %v74_v6, %v72_v5  ;;  %v71_v9 = vld [vmem:[%s765_s0 + $0x20] sm:$0xff]  ;;  %v73_v10 = vld [vmem:[%s765_s0 + $0x30] sm:$0xff]  ;;  %v76_v11 = vld [vmem:[%s765_s0 + $0x48] sm:$0xff] }
   0x4   :  { %331 = vmatprep.subr.bf16.mxu0 %v330_v3  ;;  %390 = vmatprep.subr.bf16.mxu1 %v330_v3  ;;  %v78_v12 = vld [vmem:[%s765_s0 + $0x58] sm:$0xff]  ;;  %v336_v13 = vpack.c.bf16 %v73_v10, %v71_v9  ;;  %v75_v15 = vld [vmem:[%s765_s0 + $0x40] sm:$0xff]  ;;  %v77_v16 = vld [vmem:[%s765_s0 + $0x50] sm:$0xff]  ;;  %v43_v37 = vsub.s32 1, %v530_v30 }
   0x5   :  { %333 = vmatpush1.bf16.msra.mxu0 %v332_v7  ;;  %405 = vmatpush1.bf16.msra.mxu1 %v332_v7  ;;  %v338_v14 = vpack.c.bf16 %v78_v12, %v76_v11  ;;  %v80_v17 = vld [vmem:[%s765_s0 + $0x68] sm:$0xff]  ;;  %v82_v18 = vld [vmem:[%s765_s0 + $0x78] sm:$0xff]  ;;  %v340_v19 = vpack.c.bf16 %v77_v16, %v75_v15  ;;  %v79_v21 = vld [vmem:[%s765_s0 + $0x60] sm:$0xff] }
   0x6   :  { %335 = vmatprep.subr.bf16.mxu0 %v334_v8  ;;  %391 = vmatprep.subr.bf16.mxu1 %v334_v8  ;;  %v342_v20 = vpack.c.bf16 %v82_v18, %v80_v17  ;;  %v81_v22 = vld [vmem:[%s765_s0 + $0x70] sm:$0xff]  ;;  %v84_v24 = vld [vmem:[%s765_s0 + $0x88] sm:$0xff]  ;;  %v86_v25 = vld [vmem:[%s765_s0 + $0x98] sm:$0xff] }
   0x7   :  { %v344_v26 = vpack.c.bf16 %v81_v22, %v79_v21  ;;  %v346_v27 = vpack.c.bf16 %v86_v25, %v84_v24  ;;  %v83_v28 = vld [vmem:[%s765_s0 + $0x80] sm:$0xff]  ;;  %v85_v29 = vld [vmem:[%s765_s0 + $0x90] sm:$0xff]  ;;  %v88_v31 = vld [vmem:[%s765_s0 + $0xa8] sm:$0xff] }
   0x8   :  { %v90_v32 = vld [vmem:[%s765_s0 + $0xb8] sm:$0xff]  ;;  %v348_v33 = vpack.c.bf16 %v85_v29, %v83_v28  ;;  %v87_v35 = vld [vmem:[%s765_s0 + $0xa0] sm:$0xff]  ;;  %v89_v36 = vld [vmem:[%s765_s0 + $0xb0] sm:$0xff] }
   0x9   :  { %337 = vmatpush1.bf16.msra.mxu0 %v336_v13  ;;  %406 = vmatpush1.bf16.msra.mxu1 %v336_v13  ;;  %v350_v34 = vpack.c.bf16 %v90_v32, %v88_v31  ;;  %v92_v38 = vld [vmem:[%s765_s0 + $0xc8] sm:$0xff]  ;;  %v94_v39 = vld [vmem:[%s765_s0 + $0xd8] sm:$0xff]  ;;  %v352_v40 = vpack.c.bf16 %v89_v36, %v87_v35  ;;  %v557_v42 = vld [vmem:[%s766_s1] sm:$0x3] }
   0xa   :  { %339 = vmatprep.subr.bf16.mxu0 %v338_v14  ;;  %392 = vmatprep.subr.bf16.mxu1 %v338_v14  ;;  %v16_v41 = vld [vmem:[%s767_s2 + $0x8] sm:$0xff]  ;;  %v26_v43 = vld [vmem:[%s767_s2 + $0x58] sm:$0xff]  ;;  %v354_v44 = vpack.c.bf16 %v94_v39, %v92_v38  ;;  %v91_v45 = vld [vmem:[%s765_s0 + $0xc0] sm:$0xff]  ;;  %v569_v47 = vrot.slane %v557_v42, %v43_v37 }
   0xb   :  { %v93_v46 = vld [vmem:[%s765_s0 + $0xd0] sm:$0xff]  ;;  %v96_v48 = vld [vmem:[%s765_s0 + $0xe8] sm:$0xff]  ;;  %v98_v49 = vld [vmem:[%s765_s0 + $0xf8] sm:$0xff] }
   0xc   :  { %v48_v50 = vmul.f32 %v569_v47, %v16_v41  ;;  %v58_v51 = vmul.f32 %v569_v47, %v26_v43  ;;  %v356_v52 = vpack.c.bf16 %v93_v46, %v91_v45  ;;  %v358_v53 = vpack.c.bf16 %v98_v49, %v96_v48  ;;  %v95_v54 = vld [vmem:[%s765_s0 + $0xe0] sm:$0xff]  ;;  %v97_v55 = vld [vmem:[%s765_s0 + $0xf0] sm:$0xff]  ;;  %v100_v56 = vld [vmem:[%s765_s0 + $0x108] sm:$0xff] }
   0xd   :  { %341 = vmatpush1.bf16.msra.mxu0 %v340_v19  ;;  %407 = vmatpush1.bf16.msra.mxu1 %v340_v19  ;;  %v102_v57 = vld [vmem:[%s765_s0 + $0x118] sm:$0xff] }
   0xe   :  { %343 = vmatprep.subr.bf16.mxu0 %v342_v20  ;;  %393 = vmatprep.subr.bf16.mxu1 %v342_v20 }
   0xf   :  { %320 = vmatprep.mubr.msk.f32.mxu0 %vm127_vm0, %v48_v50  ;;  %325 = vmatprep.mubr.msk.f32.mxu1 %vm127_vm0, %v58_v51 }
  0x11   :  { %345 = vmatpush1.bf16.msra.mxu0 %v344_v26  ;;  %408 = vmatpush1.bf16.msra.mxu1 %v344_v26 }
  0x12   :  { %347 = vmatprep.subr.bf16.mxu0 %v346_v27  ;;  %394 = vmatprep.subr.bf16.mxu1 %v346_v27 }
  0x15   :  { %349 = vmatpush1.bf16.msra.mxu0 %v348_v33  ;;  %409 = vmatpush1.bf16.msra.mxu1 %v348_v33 }
  0x16   :  { %351 = vmatprep.subr.bf16.mxu0 %v350_v34  ;;  %395 = vmatprep.subr.bf16.mxu1 %v350_v34 }
  0x19   :  { %353 = vmatpush1.bf16.msra.mxu0 %v352_v40  ;;  %410 = vmatpush1.bf16.msra.mxu1 %v352_v40 }
  0x1a   :  { %355 = vmatprep.subr.bf16.mxu0 %v354_v44  ;;  %396 = vmatprep.subr.bf16.mxu1 %v354_v44 }
  0x1b   :  { %8 = vsyncpa [#allocation3], 0  ;;  %v360_v58 = vpack.c.bf16 %v97_v55, %v95_v54  ;;  %v362_v59 = vpack.c.bf16 %v102_v57, %v100_v56  ;;  %v99_v60 = vld [vmem:[%s765_s0 + $0x100] sm:$0xff]  ;;  %v101_v61 = vld [vmem:[%s765_s0 + $0x110] sm:$0xff]  ;;  %v39_v31 = vsub.s32 0, %v530_v30  ;;  %vm284_vm1 = vcmask 556032  }
  0x1c   :  { %v104_v62 = vld [vmem:[%s765_s0 + $0x128] sm:$0xff]  ;;  %v106_v63 = vld [vmem:[%s765_s0 + $0x138] sm:$0xff]  ;;  %v364_v0 = vpack.c.bf16 %v101_v61, %v99_v60  ;;  %v103_v2 = vld [vmem:[%s765_s0 + $0x120] sm:$0xff] }
  0x1d   :  { %357 = vmatpush1.bf16.msra.mxu0 %v356_v52  ;;  %411 = vmatpush1.bf16.msra.mxu1 %v356_v52  ;;  %v366_v1 = vpack.c.bf16 %v106_v63, %v104_v62  ;;  %v105_v3 = vld [vmem:[%s765_s0 + $0x130] sm:$0xff]  ;;  %v108_v4 = vld [vmem:[%s765_s0 + $0x148] sm:$0xff]  ;;  %v110_v5 = vld [vmem:[%s765_s0 + $0x158] sm:$0xff]  ;;  %v40_v36 = vrot.slane %v557_v42, %v39_v31 }
  0x1e   :  { %359 = vmatprep.subr.bf16.mxu0 %v358_v53  ;;  %397 = vmatprep.subr.bf16.mxu1 %v358_v53  ;;  %v368_v6 = vpack.c.bf16 %v105_v3, %v103_v2  ;;  %v370_v7 = vpack.c.bf16 %v110_v5, %v108_v4  ;;  %v107_v8 = vld [vmem:[%s765_s0 + $0x140] sm:$0xff]  ;;  %v109_v9 = vld [vmem:[%s765_s0 + $0x150] sm:$0xff]  ;;  %v112_v10 = vld [vmem:[%s765_s0 + $0x168] sm:$0xff] }
  0x1f   :  { %v114_v11 = vld [vmem:[%s765_s0 + $0x178] sm:$0xff]  ;;  %v372_v12 = vpack.c.bf16 %v109_v9, %v107_v8  ;;  %v111_v14 = vld [vmem:[%s765_s0 + $0x160] sm:$0xff]  ;;  %v113_v15 = vld [vmem:[%s765_s0 + $0x170] sm:$0xff] }
  0x20   :  { %v374_v13 = vpack.c.bf16 %v114_v11, %v112_v10  ;;  %v116_v16 = vld [vmem:[%s765_s0 + $0x188] sm:$0xff]  ;;  %v118_v17 = vld [vmem:[%s765_s0 + $0x198] sm:$0xff]  ;;  %v376_v18 = vpack.c.bf16 %v113_v15, %v111_v14  ;;  %v115_v20 = vld [vmem:[%s765_s0 + $0x180] sm:$0xff] }
  0x21   :  { %361 = vmatpush1.bf16.msra.mxu0 %v360_v58  ;;  %412 = vmatpush1.bf16.msra.mxu1 %v360_v58  ;;  %v378_v19 = vpack.c.bf16 %v118_v17, %v116_v16  ;;  %v117_v21 = vld [vmem:[%s765_s0 + $0x190] sm:$0xff]  ;;  %v120_v22 = vld [vmem:[%s765_s0 + $0x1a8] sm:$0xff]  ;;  %v122_v23 = vld [vmem:[%s765_s0 + $0x1b8] sm:$0xff] }
  0x22   :  { %363 = vmatprep.subr.bf16.mxu0 %v362_v59  ;;  %398 = vmatprep.subr.bf16.mxu1 %v362_v59  ;;  %v380_v24 = vpack.c.bf16 %v117_v21, %v115_v20  ;;  %v382_v25 = vpack.c.bf16 %v122_v23, %v120_v22  ;;  %v119_v26 = vld [vmem:[%s765_s0 + $0x1a0] sm:$0xff]  ;;  %v121_v27 = vld [vmem:[%s765_s0 + $0x1b0] sm:$0xff]  ;;  %v124_v28 = vld [vmem:[%s765_s0 + $0x1c8] sm:$0xff] }
  0x23   :  { %v126_v29 = vld [vmem:[%s765_s0 + $0x1d8] sm:$0xff]  ;;  %v384_v32 = vpack.c.bf16 %v121_v27, %v119_v26  ;;  %v123_v34 = vld [vmem:[%s765_s0 + $0x1c0] sm:$0xff]  ;;  %v125_v35 = vld [vmem:[%s765_s0 + $0x1d0] sm:$0xff] }
  0x24   :  { %v386_v33 = vpack.c.bf16 %v126_v29, %v124_v28  ;;  %v388_v37 = vpack.c.bf16 %v125_v35, %v123_v34  ;;  %v15_v30 = vld [vmem:[%s767_s2] sm:$0xff]  ;;  %v25_v38 = vld [vmem:[%s767_s2 + $0x50] sm:$0xff]  ;;  %v18_v39 = vld [vmem:[%s767_s2 + $0x18] sm:$0xff] }
  0x25   :  { %365 = vmatpush1.bf16.msra.mxu0 %v364_v0  ;;  %413 = vmatpush1.bf16.msra.mxu1 %v364_v0  ;;  %v28_v40 = vld [vmem:[%s767_s2 + $0x68] sm:$0xff]  ;;  %v47_v41 = vmul.f32 %v40_v36, %v15_v30  ;;  %v57_v42 = vmul.f32 %v40_v36, %v25_v38  ;;  %v50_v43 = vmul.f32 %v569_v47, %v18_v39  ;;  %v17_v45 = vld [vmem:[%s767_s2 + $0x10] sm:$0xff]  ;;  %v27_v46 = vld [vmem:[%s767_s2 + $0x60] sm:$0xff] }
  0x26   :  { %367 = vmatprep.subr.bf16.mxu0 %v366_v1  ;;  %399 = vmatprep.subr.bf16.mxu1 %v366_v1  ;;  %v60_v44 = vmul.f32 %v569_v47, %v28_v40  ;;  %v20_v48 = vld [vmem:[%s767_s2 + $0x28] sm:$0xff]  ;;  %v30_v49 = vld [vmem:[%s767_s2 + $0x78] sm:$0xff]  ;;  %v49_v50 = vmul.f32 %v40_v36, %v17_v45  ;;  %v59_v51 = vmul.f32 %v40_v36, %v27_v46  ;;  %v19_v54 = vld [vmem:[%s767_s2 + $0x20] sm:$0xff] }
  0x27   :  { %v52_v52 = vmul.f32 %v569_v47, %v20_v48  ;;  %v62_v53 = vmul.f32 %v569_v47, %v30_v49  ;;  %v29_v55 = vld [vmem:[%s767_s2 + $0x70] sm:$0xff]  ;;  %v22_v56 = vld [vmem:[%s767_s2 + $0x38] sm:$0xff]  ;;  %v32_v57 = vld [vmem:[%s767_s2 + $0x88] sm:$0xff]  ;;  %v51_v58 = vmul.f32 %v40_v36, %v19_v54 }
  0x28   :  { %v61_v59 = vmul.f32 %v40_v36, %v29_v55  ;;  %v54_v60 = vmul.f32 %v569_v47, %v22_v56  ;;  %v64_v61 = vmul.f32 %v569_v47, %v32_v57  ;;  %v21_v62 = vld [vmem:[%s767_s2 + $0x30] sm:$0xff]  ;;  %v31_v63 = vld [vmem:[%s767_s2 + $0x80] sm:$0xff]  ;;  %v24_v0 = vld [vmem:[%s767_s2 + $0x48] sm:$0xff] }
  0x29   :  { %369 = vmatpush1.bf16.msra.mxu0 %v368_v6  ;;  %414 = vmatpush1.bf16.msra.mxu1 %v368_v6  ;;  %v34_v1 = vld [vmem:[%s767_s2 + $0x98] sm:$0xff]  ;;  %v53_v2 = vmul.f32 %v40_v36, %v21_v62  ;;  %v63_v3 = vmul.f32 %v40_v36, %v31_v63  ;;  %v56_v4 = vmul.f32 %v569_v47, %v24_v0  ;;  %v23_v6 = vld [vmem:[%s767_s2 + $0x40] sm:$0xff] }
  0x2a   :  { %371 = vmatprep.subr.bf16.mxu0 %v370_v7  ;;  %400 = vmatprep.subr.bf16.mxu1 %v370_v7  ;;  %v66_v5 = vmul.f32 %v569_v47, %v34_v1  ;;  %v33_v7 = vld [vmem:[%s767_s2 + $0x90] sm:$0xff]  ;;  %v55_v8 = vmul.f32 %v40_v36, %v23_v6  ;;  %s447_s2 = smov [#allocation2]  }
  0x2b   :  { %v65_v9 = vmul.f32 %v40_v36, %v33_v7  ;;  %s309_s6 = sshll.u32 %s447_s2, 4  ;;  %s310_s6 = int_to_ptr.vmem [resolvable:$true] %s309_s6 }
  0x2c   :  { %s423_s7 = scalar_lea.vmem %s310_s6, 2560  ;;  %p428_p1 = scmp.lt.s32.totalorder %s310_s6, %s310_s6 }
  0x2d   :  { %373 = vmatpush1.bf16.msra.mxu0 %v372_v12  ;;  %415 = vmatpush1.bf16.msra.mxu1 %v372_v12  ;;  %p424_p0 = scmp.ne.s32.totalorder %s310_s6, %s423_s7  ;;  %p429_p2 = scmp.lt.s32.totalorder %s423_s7, %s423_s7 }
  0x2e   :  { %375 = vmatprep.subr.bf16.mxu0 %v374_v13  ;;  %401 = vmatprep.subr.bf16.mxu1 %v374_v13 }
  0x2f   :  { %p430_p3 = por %p429_p2, %p428_p1 }
  0x31   :  { %377 = vmatpush1.bf16.msra.mxu0 %v376_v18  ;;  %416 = vmatpush1.bf16.msra.mxu1 %v376_v18  ;;  %p431_p4 = pnand %p430_p3, %p424_p0 }
  0x32   :  { %379 = vmatprep.subr.bf16.mxu0 %v378_v19  ;;  %402 = vmatprep.subr.bf16.mxu1 %v378_v19 }
  0x35   :  { %381 = vmatpush1.bf16.msra.mxu0 %v380_v24  ;;  %417 = vmatpush1.bf16.msra.mxu1 %v380_v24 }
  0x36   :  { %383 = vmatprep.subr.bf16.mxu0 %v382_v25  ;;  %403 = vmatprep.subr.bf16.mxu1 %v382_v25 }
  0x39   :  { %385 = vmatpush1.bf16.msra.mxu0 %v384_v32  ;;  %418 = vmatpush1.bf16.msra.mxu1 %v384_v32 }
  0x3a   :  { %387 = vmatprep.subr.bf16.mxu0 %v386_v33  ;;  %404 = vmatprep.subr.bf16.mxu1 %v386_v33 }
  0x3d   :  { %389 = vmatpush1.bf16.msra.mxu0 %v388_v37  ;;  %419 = vmatpush1.bf16.msra.mxu1 %v388_v37 }
  0x40   :  { %223 = vmatmul.mubr.f32.vlgmr.msra.gmra.mrb[0].mxu0 %v47_v41  ;;  %253 = vmatmul.mubr.f32.vlgmr.msra.gmra.mrb[0].mxu1 %v57_v42 }
  0x41   :  { %321 = vmatprep.mubr.msk.f32.mxu0 %vm127_vm0, %v50_v43  ;;  %326 = vmatprep.mubr.msk.f32.mxu1 %vm127_vm0, %v60_v44 }
  0x44   :  { %229 = vmatmul.mubr.f32.gmra.mrb[2].mxu0 %v49_v50  ;;  %259 = vmatmul.mubr.f32.gmra.mrb[2].mxu1 %v59_v51 }
  0x45   :  { %322 = vmatprep.mubr.msk.f32.mxu0 %vm127_vm0, %v52_v52  ;;  %327 = vmatprep.mubr.msk.f32.mxu1 %vm127_vm0, %v62_v53 }
  0x48   :  { %235 = vmatmul.mubr.f32.gmra.mrb[4].mxu0 %v51_v58  ;;  %265 = vmatmul.mubr.f32.gmra.mrb[4].mxu1 %v61_v59 }
  0x49   :  { %323 = vmatprep.mubr.msk.f32.mxu0 %vm127_vm0, %v54_v60  ;;  %328 = vmatprep.mubr.msk.f32.mxu1 %vm127_vm0, %v64_v61 }
  0x4c   :  { %241 = vmatmul.mubr.f32.gmra.mrb[6].mxu0 %v53_v2  ;;  %271 = vmatmul.mubr.f32.gmra.mrb[6].mxu1 %v63_v3 }
  0x4d   :  { %324 = vmatprep.mubr.msk.f32.mxu0 %vm127_vm0, %v56_v4  ;;  %329 = vmatprep.mubr.msk.f32.mxu1 %vm127_vm0, %v66_v5 }
  0x50   :  { %247 = vmatmul.mubr.f32.gmra.mrb[8].mxu0 %v55_v8  ;;  %277 = vmatmul.mubr.f32.gmra.mrb[8].mxu1 %v65_v9 }
 0x113   :  { %v224_v47 = vpop.f32.mrb[0].mxu0  ;;  %v254_v10 = vpop.f32.mrb[0].mxu1 }
 0x114   :  { %283 = vst [vmem:[#allocation2] sm:$0xff] %v224_v47  ;;  %294 = vst [vmem:[#allocation2 + $0x50] sm:$0xff] %v254_v10  ;;  %v226_v11 = vpop.f32.mrb[1].mxu0  ;;  %v256_v12 = vpop.f32.mrb[1].mxu1 }
 0x115   :  { %285 = vst.msk [vmem:[#allocation2 + $0x8] sm:$0xff] %vm284_vm1, %v226_v11  ;;  %295 = vst.msk [vmem:[#allocation2 + $0x58] sm:$0xff] %vm284_vm1, %v256_v12 }
 0x117   :  { %v230_v13 = vpop.f32.mrb[2].mxu0  ;;  %v260_v14 = vpop.f32.mrb[2].mxu1 }
 0x118   :  { %286 = vst [vmem:[#allocation2 + $0x10] sm:$0xff] %v230_v13  ;;  %296 = vst [vmem:[#allocation2 + $0x60] sm:$0xff] %v260_v14  ;;  %v232_v15 = vpop.f32.mrb[3].mxu0  ;;  %v262_v16 = vpop.f32.mrb[3].mxu1 }
 0x119   :  { %287 = vst.msk [vmem:[#allocation2 + $0x18] sm:$0xff] %vm284_vm1, %v232_v15  ;;  %297 = vst.msk [vmem:[#allocation2 + $0x68] sm:$0xff] %vm284_vm1, %v262_v16 }
 0x11b   :  { %v236_v17 = vpop.f32.mrb[4].mxu0  ;;  %v266_v18 = vpop.f32.mrb[4].mxu1 }
 0x11c   :  { %288 = vst [vmem:[#allocation2 + $0x20] sm:$0xff] %v236_v17  ;;  %298 = vst [vmem:[#allocation2 + $0x70] sm:$0xff] %v266_v18  ;;  %v238_v19 = vpop.f32.mrb[5].mxu0  ;;  %v268_v20 = vpop.f32.mrb[5].mxu1 }
 0x11d   :  { %289 = vst.msk [vmem:[#allocation2 + $0x28] sm:$0xff] %vm284_vm1, %v238_v19  ;;  %299 = vst.msk [vmem:[#allocation2 + $0x78] sm:$0xff] %vm284_vm1, %v268_v20 }
 0x11f   :  { %v242_v21 = vpop.f32.mrb[6].mxu0  ;;  %v272_v22 = vpop.f32.mrb[6].mxu1 }
 0x120   :  { %290 = vst [vmem:[#allocation2 + $0x30] sm:$0xff] %v242_v21  ;;  %300 = vst [vmem:[#allocation2 + $0x80] sm:$0xff] %v272_v22  ;;  %v244_v23 = vpop.f32.mrb[7].mxu0  ;;  %v274_v24 = vpop.f32.mrb[7].mxu1 }
 0x121   :  { %291 = vst.msk [vmem:[#allocation2 + $0x38] sm:$0xff] %vm284_vm1, %v244_v23  ;;  %301 = vst.msk [vmem:[#allocation2 + $0x88] sm:$0xff] %vm284_vm1, %v274_v24 }
 0x123   :  { %v248_v25 = vpop.f32.mrb[8].mxu0  ;;  %v278_v26 = vpop.f32.mrb[8].mxu1 }
 0x124   :  { %292 = vst [vmem:[#allocation2 + $0x40] sm:$0xff] %v248_v25  ;;  %302 = vst [vmem:[#allocation2 + $0x90] sm:$0xff] %v278_v26  ;;  %v250_v27 = vpop.f32.mrb[9].mxu0  ;;  %v280_v28 = vpop.f32.mrb[9].mxu1 }
 0x125   :  { %293 = vst.msk [vmem:[#allocation2 + $0x48] sm:$0xff] %vm284_vm1, %v250_v27  ;;  %303 = vst.msk [vmem:[#allocation2 + $0x98] sm:$0xff] %vm284_vm1, %v280_v28 }
 0x126   :  { %434 = shalt.err (!%p431_p4)
}
 0x127   :  { %s435_s10 = scalar_lea.hbm %s768_s3, 2560 }
 0x128   :  { %p436_p5 = scmp.ne.s32.totalorder %s768_s3, %s435_s10  ;;  %p439_p6 = scmp.lt.u32.totalorder %s435_s10, %s768_s3 }
 0x12a   :  { %p441_p7 = pnand %p439_p6, %p436_p5 }
 0x12c   :  { %444 = shalt.err (!%p441_p7)
}
 0x12d   :  { %s448_s15 = smov 256   ;;  %s449_s16 = smov 16  }
 0x12e   :  { %315 = dma.vmem_to_hbm [thread:$0]  %s310_s6, 2560, %s768_s3, [#allocation3], %s448_s15, %s448_s15, %s449_s16  }
 0x12f   :  { %445 = dma.done.wait [#allocation3], 2560  }
 0x130   :  { %446 = vsyncadd [#allocation3], 4294964736 }
 0x131   :  { %319 = vsyncpa [#allocation3], 1 }

</bundles_post_ra>
